<compile_context>
chip_gen: v5e
topology: v5e:2x2
jax: 0.10.0
libtpu: 0.0.40
codegen_flags: <defaults>
</compile_context>

<pallas_src>
import functools

import jax
import jax.numpy as jnp
from jax.experimental import pallas as pl
from jax.experimental.pallas import tpu as pltpu

_LANE = 128


def _round_up(v, m):
    return (v + m - 1) // m * m


# --------------------------------------------------------------------------- #
# Kernel
# --------------------------------------------------------------------------- #
def _mlp_head_kernel(x_ref, w1_ref, b1_ref, w2_ref, b2_ref, w3_ref, b3_ref,
                     w4_ref, o_ref):
    # x_ref:  (1, E, TN) slab of points (channels-first, lane dim = points),
    #         already in the compute dtype on the bf16 path.
    # wK_ref: full (out, in) weight matrices (BN scale folded in), compute dtype.
    # bK_ref: (out, 1) folded BN shift, f32.
    # o_ref:  (1, 3, TN)
    cdt = w1_ref.dtype
    x = x_ref[0]
    if x.dtype != cdt:                       # no-op when x already arrives in cdt
        x = x.astype(cdt)

    h = jnp.dot(w1_ref[...], x, preferred_element_type=jnp.float32)
    h = jnp.maximum(h + b1_ref[...], 0.0).astype(cdt)    # (E/2, TN)

    h = jnp.dot(w2_ref[...], h, preferred_element_type=jnp.float32)
    h = jnp.maximum(h + b2_ref[...], 0.0).astype(cdt)    # (E/4, TN)

    h = jnp.dot(w3_ref[...], h, preferred_element_type=jnp.float32)
    h = jnp.maximum(h + b3_ref[...], 0.0).astype(cdt)    # (E/8, TN)

    y = jnp.dot(w4_ref[...], h, preferred_element_type=jnp.float32)  # (3, TN)
    o_ref[0] = y.astype(o_ref.dtype)


# --------------------------------------------------------------------------- #
# Wrapper
# --------------------------------------------------------------------------- #
@functools.partial(jax.jit, static_argnames=("tile_n",))
def mlp_head_forward(x, prepared_params, tile_n=1024):
    """x: (B, E, N) -> (B, 3, N), matching MLPHead.forward (eval-mode BN)."""
    w1, b1, w2, b2, w3, b3, w4 = prepared_params
    B, E, N = x.shape
    c_out = w4.shape[0]
    cdt = w1.dtype
    out_dtype = x.dtype

    # Feed the kernel x in the compute dtype: halves the dominant HBM read.
    if cdt == jnp.bfloat16 and x.dtype != jnp.bfloat16:
        x = x.astype(jnp.bfloat16)

    # Lane-dense point tile (multiple of 128), as large as requested; keep the
    # grid >= 2 points when B == 1 so both v7x TensorCores are busy.
    n_target = max(_LANE, _round_up(N, _LANE))
    tn = min(tile_n, n_target)
    tn = max(_LANE, (tn // _LANE) * _LANE)
    if B == 1 and n_target // tn < 2 and tn > _LANE:
        tn = max(_LANE, ((n_target // 2) // _LANE) * _LANE)

    # Pad N to a multiple of the tile: unmasked loads/stores, no ragged block.
    n_pad = _round_up(max(N, tn), tn)
    if n_pad != N:
        x = jnp.pad(x, ((0, 0), (0, 0), (0, n_pad - N)))
    grid = (B, n_pad // tn)

    # Explicit VMEM budget (double-buffered x/out, single-buffered weights,
    # f32 intermediates).  Floor 32 MiB, cap 48 MiB (safe on v5e/v6e/v7x).
    x_bytes = jnp.dtype(x.dtype).itemsize
    c_bytes = jnp.dtype(cdt).itemsize
    o_bytes = jnp.dtype(out_dtype).itemsize
    w_bytes = sum(int(p.size) * jnp.dtype(p.dtype).itemsize
                  for p in prepared_params)
    est = (2 * E * tn * x_bytes
           + 2 * _round_up(c_out, 8) * tn * o_bytes
           + w_bytes
           + (E // 2 + E // 4 + E // 8) * tn * (4 + c_bytes))
    vmem_limit = int(min(max(2 * est, 32 * 2 ** 20), 48 * 2 ** 20))

    # Weights/biases keep the same block index forever -> single buffer.
    def resident(shape):
        return pl.BlockSpec(shape, lambda b, n: (0,) * len(shape),
                            pipeline_mode=pl.Buffered(1))

    flops = 2 * B * n_pad * (E * (E // 2) + (E // 2) * (E // 4)
                             + (E // 4) * (E // 8) + (E // 8) * c_out)
    bytes_accessed = (B * E * n_pad * x_bytes + w_bytes
                      + B * c_out * n_pad * o_bytes)

    out = pl.pallas_call(
        _mlp_head_kernel,
        out_shape=jax.ShapeDtypeStruct((B, c_out, n_pad), out_dtype),
        grid_spec=pltpu.PrefetchScalarGridSpec(
            num_scalar_prefetch=0,
            grid=grid,
            in_specs=[
                pl.BlockSpec((1, E, tn), lambda b, n: (b, 0, n)),   # x slab
                resident(w1.shape), resident(b1.shape),
                resident(w2.shape), resident(b2.shape),
                resident(w3.shape), resident(b3.shape),
                resident(w4.shape),
            ],
            out_specs=pl.BlockSpec((1, c_out, tn), lambda b, n: (b, 0, n)),
        ),
        compiler_params=pltpu.CompilerParams(
            dimension_semantics=("parallel", "parallel"),
            vmem_limit_bytes=vmem_limit),
        cost_estimate=pl.CostEstimate(flops=flops, transcendentals=0,
                                      bytes_accessed=bytes_accessed),
    )(x, w1, b1, w2, b2, w3, b3, w4)

    return out if n_pad == N else out[:, :, :N]


# --------------------------------------------------------------------------- #
# Parameter construction / prep (one-time, hoisted out of the forward)
# --------------------------------------------------------------------------- #
def init_params(key, emb_dims):
    """Deterministic PyTorch-style init for MLPHead(emb_dims)."""
    dims = [emb_dims, emb_dims // 2, emb_dims // 4, emb_dims // 8]
    layers = []
    for j in range(3):
        in_d, out_d = dims[j], dims[j + 1]
        kw, kg, kb, km, kv = jax.random.split(jax.random.fold_in(key, j), 5)
        bound = 1.0 / (in_d ** 0.5)
        w = jax.random.uniform(kw, (out_d, in_d), jnp.float32, -bound, bound)
        gamma = jax.random.uniform(kg, (out_d,), jnp.float32, 0.5, 1.5)
        beta = jax.random.uniform(kb, (out_d,), jnp.float32, -0.5, 0.5)
        mean = jax.random.uniform(km, (out_d,), jnp.float32, -0.5, 0.5)
        var = jax.random.uniform(kv, (out_d,), jnp.float32, 0.5, 1.5)
        layers.append((w, gamma, beta, mean, var))
    bound = 1.0 / (dims[3] ** 0.5)
    w_out = jax.random.uniform(jax.random.fold_in(key, 100), (3, dims[3]),
                               jnp.float32, -bound, bound)
    return {"layers": layers, "w_out": w_out}


def prepare_params(raw, compute_dtype=jnp.bfloat16, eps=1e-5):
    """Fold eval-mode BatchNorm into the 1x1 conv weights; cast for the MXU."""
    prepped = []
    for w, gamma, beta, mean, var in raw["layers"]:
        scale = gamma / jnp.sqrt(var + eps)
        w_f = (w * scale[:, None]).astype(compute_dtype)             # (out, in)
        b_f = ((beta - mean * scale)[:, None]).astype(jnp.float32)   # (out, 1)
        prepped += [w_f, b_f]
    prepped.append(raw["w_out"].astype(compute_dtype))
    return tuple(prepped)


# --------------------------------------------------------------------------- #
# Pure-JAX reference (conv -> BN(eval) -> ReLU, then final conv)
# --------------------------------------------------------------------------- #
def mlp_head_reference(x, raw, eps=1e-5):
    h = x
    hp = jax.lax.Precision.HIGHEST
    for w, gamma, beta, mean, var in raw["layers"]:
        h = jnp.einsum("oi,bin->bon", w, h, precision=hp)
        scale = gamma / jnp.sqrt(var + eps)
        h = h * scale[None, :, None] + (beta - mean * scale)[None, :, None]
        h = jax.nn.relu(h)
    return jnp.einsum("oi,bin->bon", raw["w_out"], h, precision=hp)


# --------------------------------------------------------------------------- #
# Test
# --------------------------------------------------------------------------- #
if __name__ == "__main__":
    key = jax.random.PRNGKey(0)
    EMB = 256                                  # channels 256->128->64->32->3

    raw = init_params(key, EMB)

    # Config A: f32 compute path, tight correctness check (B=2, N=256).
    B, N = 2, 256
    x = jax.random.normal(jax.random.fold_in(key, 123), (B, EMB, N), jnp.float32)
    y_ref = mlp_head_reference(x, raw)

    p_f32 = prepare_params(raw, compute_dtype=jnp.float32)
    y_f32 = jax.block_until_ready(mlp_head_forward(x, p_f32))
    assert y_f32.shape == (B, 3, N)
    assert jnp.allclose(y_f32, y_ref, atol=1e-3, rtol=1e-3), (
        float(jnp.max(jnp.abs(y_f32 - y_ref))))

    # Config B: bf16 MXU path (perf config) with ragged N -> exercises N
    # padding and the B==1 two-grid-point split for v7x.  bf16 x is a
    # documented accuracy tradeoff, hence the loose tolerance.
    B2, N2 = 1, 200
    x2 = jax.random.normal(jax.random.fold_in(key, 321), (B2, EMB, N2),
                           jnp.float32)
    y2_ref = mlp_head_reference(x2, raw)
    p_bf16 = prepare_params(raw, compute_dtype=jnp.bfloat16)
    y2 = jax.block_until_ready(mlp_head_forward(x2, p_bf16))
    assert y2.shape == (B2, 3, N2)
    assert jnp.allclose(y2, y2_ref, atol=1e-1, rtol=1e-1), (
        float(jnp.max(jnp.abs(y2 - y2_ref))))

    print("KERNEL_OK")
</pallas_src>

<mosaic_0001>
module attributes {stable_mosaic.version = 11 : i64} {
  func.func @_mlp_head_kernel(%arg0: i32, %arg1: i32, %arg2: memref<1x256x256xf32, #tpu.memory_space<vmem>>, %arg3: memref<128x256xf32, #tpu.memory_space<vmem>>, %arg4: memref<128x1xf32, #tpu.memory_space<vmem>>, %arg5: memref<64x128xf32, #tpu.memory_space<vmem>>, %arg6: memref<64x1xf32, #tpu.memory_space<vmem>>, %arg7: memref<32x64xf32, #tpu.memory_space<vmem>>, %arg8: memref<32x1xf32, #tpu.memory_space<vmem>>, %arg9: memref<3x32xf32, #tpu.memory_space<vmem>>, %arg10: memref<1x3x256xf32, #tpu.memory_space<vmem>>) attributes {dimension_semantics = [#tpu.dimension_semantics<parallel>, #tpu.dimension_semantics<parallel>], iteration_bounds = array<i64: 2, 1>, scalar_prefetch = 0 : i64, scratch_operands = 0 : i64, tpu.core_type = #tpu.core_type<tc>, window_params = [{transform_indices = @transform_0, window_bounds = array<i64: 1, 256, 256>}, {pipeline_mode = #tpu.pipeline_mode<synchronous>, transform_indices = @transform_1, window_bounds = array<i64: 128, 256>}, {pipeline_mode = #tpu.pipeline_mode<synchronous>, transform_indices = @transform_2, window_bounds = array<i64: 128, 1>}, {pipeline_mode = #tpu.pipeline_mode<synchronous>, transform_indices = @transform_3, window_bounds = array<i64: 64, 128>}, {pipeline_mode = #tpu.pipeline_mode<synchronous>, transform_indices = @transform_4, window_bounds = array<i64: 64, 1>}, {pipeline_mode = #tpu.pipeline_mode<synchronous>, transform_indices = @transform_5, window_bounds = array<i64: 32, 64>}, {pipeline_mode = #tpu.pipeline_mode<synchronous>, transform_indices = @transform_6, window_bounds = array<i64: 32, 1>}, {pipeline_mode = #tpu.pipeline_mode<synchronous>, transform_indices = @transform_7, window_bounds = array<i64: 3, 32>}, {transform_indices = @transform_8, window_bounds = array<i64: 1, 3, 256>}]} {
    %c0 = arith.constant 0 : index
    %c0_0 = arith.constant 0 : index
    %c0_1 = arith.constant 0 : index
    %0 = vector.load %arg2[%c0, %c0_0, %c0_1] : memref<1x256x256xf32, #tpu.memory_space<vmem>>, vector<1x256x256xf32>
    %1 = vector.shape_cast %0 : vector<1x256x256xf32> to vector<256x256xf32>
    %c0_2 = arith.constant 0 : index
    %c0_3 = arith.constant 0 : index
    %2 = vector.load %arg3[%c0_2, %c0_3] : memref<128x256xf32, #tpu.memory_space<vmem>>, vector<128x256xf32>
    %cst = arith.constant dense<0.000000e+00> : vector<128x256xf32>
    %3 = tpu.matmul %2, %1, %cst {dimension_numbers = #tpu.dot_dimension_numbers<[1], [0], [0], [1], [0, 0, 1, 1], [], []>} : vector<128x256xf32>, vector<256x256xf32>, vector<128x256xf32> -> vector<128x256xf32>
    %c0_4 = arith.constant 0 : index
    %c0_5 = arith.constant 0 : index
    %4 = vector.load %arg4[%c0_4, %c0_5] : memref<128x1xf32, #tpu.memory_space<vmem>>, vector<128x1xf32>
    %5 = vector.broadcast %4 : vector<128x1xf32> to vector<128x256xf32>
    %6 = arith.addf %3, %5 : vector<128x256xf32>
    %cst_6 = arith.constant 0.000000e+00 : f32
    %7 = vector.broadcast %cst_6 : f32 to vector<128x256xf32>
    %8 = arith.maximumf %6, %7 : vector<128x256xf32>
    %c0_7 = arith.constant 0 : index
    %c0_8 = arith.constant 0 : index
    %9 = vector.load %arg5[%c0_7, %c0_8] : memref<64x128xf32, #tpu.memory_space<vmem>>, vector<64x128xf32>
    %cst_9 = arith.constant dense<0.000000e+00> : vector<64x256xf32>
    %10 = tpu.matmul %9, %8, %cst_9 {dimension_numbers = #tpu.dot_dimension_numbers<[1], [0], [0], [1], [0, 0, 1, 1], [], []>} : vector<64x128xf32>, vector<128x256xf32>, vector<64x256xf32> -> vector<64x256xf32>
    %c0_10 = arith.constant 0 : index
    %c0_11 = arith.constant 0 : index
    %11 = vector.load %arg6[%c0_10, %c0_11] : memref<64x1xf32, #tpu.memory_space<vmem>>, vector<64x1xf32>
    %12 = vector.broadcast %11 : vector<64x1xf32> to vector<64x256xf32>
    %13 = arith.addf %10, %12 : vector<64x256xf32>
    %cst_12 = arith.constant 0.000000e+00 : f32
    %14 = vector.broadcast %cst_12 : f32 to vector<64x256xf32>
    %15 = arith.maximumf %13, %14 : vector<64x256xf32>
    %c0_13 = arith.constant 0 : index
    %c0_14 = arith.constant 0 : index
    %16 = vector.load %arg7[%c0_13, %c0_14] : memref<32x64xf32, #tpu.memory_space<vmem>>, vector<32x64xf32>
    %cst_15 = arith.constant dense<0.000000e+00> : vector<32x256xf32>
    %17 = tpu.matmul %16, %15, %cst_15 {dimension_numbers = #tpu.dot_dimension_numbers<[1], [0], [0], [1], [0, 0, 1, 1], [], []>} : vector<32x64xf32>, vector<64x256xf32>, vector<32x256xf32> -> vector<32x256xf32>
    %c0_16 = arith.constant 0 : index
    %c0_17 = arith.constant 0 : index
    %18 = vector.load %arg8[%c0_16, %c0_17] : memref<32x1xf32, #tpu.memory_space<vmem>>, vector<32x1xf32>
    %19 = vector.broadcast %18 : vector<32x1xf32> to vector<32x256xf32>
    %20 = arith.addf %17, %19 : vector<32x256xf32>
    %cst_18 = arith.constant 0.000000e+00 : f32
    %21 = vector.broadcast %cst_18 : f32 to vector<32x256xf32>
    %22 = arith.maximumf %20, %21 : vector<32x256xf32>
    %c0_19 = arith.constant 0 : index
    %c0_20 = arith.constant 0 : index
    %23 = vector.load %arg9[%c0_19, %c0_20] : memref<3x32xf32, #tpu.memory_space<vmem>>, vector<3x32xf32>
    %cst_21 = arith.constant dense<0.000000e+00> : vector<3x256xf32>
    %24 = tpu.matmul %23, %22, %cst_21 {dimension_numbers = #tpu.dot_dimension_numbers<[1], [0], [0], [1], [0, 0, 1, 1], [], []>} : vector<3x32xf32>, vector<32x256xf32>, vector<3x256xf32> -> vector<3x256xf32>
    %c0_22 = arith.constant 0 : index
    %c0_23 = arith.constant 0 : index
    %c0_24 = arith.constant 0 : index
    %25 = vector.load %arg10[%c0_22, %c0_23, %c0_24] : memref<1x3x256xf32, #tpu.memory_space<vmem>>, vector<1x3x256xf32>
    %26 = vector.shape_cast %25 : vector<1x3x256xf32> to vector<3x256xf32>
    %27 = vector.shape_cast %24 : vector<3x256xf32> to vector<1x3x256xf32>
    tpu.vector_store %arg10[%c0_22, %c0_23, %c0_24], %27 {strides = array<i32>} : memref<1x3x256xf32, #tpu.memory_space<vmem>>, vector<1x3x256xf32>,
    return
  }
  func.func @transform_0(%arg0: i32, %arg1: i32) -> (i32, i32, i32) {
    %c0_i32 = arith.constant 0 : i32
    %c0_i32_0 = arith.constant 0 : i32
    return %arg0, %c0_i32, %arg1 : i32, i32, i32
  }
  func.func @transform_1(%arg0: i32, %arg1: i32) -> (i32, i32) {
    %c0_i32 = arith.constant 0 : i32
    %c0_i32_0 = arith.constant 0 : i32
    %c0_i32_1 = arith.constant 0 : i32
    return %c0_i32, %c0_i32_0 : i32, i32
  }
  func.func @transform_2(%arg0: i32, %arg1: i32) -> (i32, i32) {
    %c0_i32 = arith.constant 0 : i32
    %c0_i32_0 = arith.constant 0 : i32
    %c0_i32_1 = arith.constant 0 : i32
    return %c0_i32, %c0_i32_0 : i32, i32
  }
  func.func @transform_3(%arg0: i32, %arg1: i32) -> (i32, i32) {
    %c0_i32 = arith.constant 0 : i32
    %c0_i32_0 = arith.constant 0 : i32
    %c0_i32_1 = arith.constant 0 : i32
    return %c0_i32, %c0_i32_0 : i32, i32
  }
  func.func @transform_4(%arg0: i32, %arg1: i32) -> (i32, i32) {
    %c0_i32 = arith.constant 0 : i32
    %c0_i32_0 = arith.constant 0 : i32
    %c0_i32_1 = arith.constant 0 : i32
    return %c0_i32, %c0_i32_0 : i32, i32
  }
  func.func @transform_5(%arg0: i32, %arg1: i32) -> (i32, i32) {
    %c0_i32 = arith.constant 0 : i32
    %c0_i32_0 = arith.constant 0 : i32
    %c0_i32_1 = arith.constant 0 : i32
    return %c0_i32, %c0_i32_0 : i32, i32
  }
  func.func @transform_6(%arg0: i32, %arg1: i32) -> (i32, i32) {
    %c0_i32 = arith.constant 0 : i32
    %c0_i32_0 = arith.constant 0 : i32
    %c0_i32_1 = arith.constant 0 : i32
    return %c0_i32, %c0_i32_0 : i32, i32
  }
  func.func @transform_7(%arg0: i32, %arg1: i32) -> (i32, i32) {
    %c0_i32 = arith.constant 0 : i32
    %c0_i32_0 = arith.constant 0 : i32
    %c0_i32_1 = arith.constant 0 : i32
    return %c0_i32, %c0_i32_0 : i32, i32
  }
  func.func @transform_8(%arg0: i32, %arg1: i32) -> (i32, i32, i32) {
    %c0_i32 = arith.constant 0 : i32
    %c0_i32_0 = arith.constant 0 : i32
    return %arg0, %c0_i32, %arg1 : i32, i32, i32
  }
}

</mosaic_0001>

<bundles_post_ra>
// kernel: mlp_head_forward.1
= control target key start
LH: loop header
LB: loop body
LE: loop exit
PB: predicated region body
PF: predicated region fallthrough
CT: control target
= control target key end

     0   :  { %s1953_s0 = inlined_call_operand.hbm [shape: f32[2,256,256], index: 0, kind: input, shape index: {}]   ;;  %s1954_s1 = inlined_call_operand.hbm [shape: f32[128,256], index: 1, kind: input, shape index: {}]   ;;  %s1955_s2 = inlined_call_operand.vmem [shape: f32[128,1], index: 2, kind: input, shape index: {}]   ;;  %s1956_s3 = inlined_call_operand.vmem [shape: f32[64,128], index: 3, kind: input, shape index: {}]   ;;  %s1957_s4 = inlined_call_operand.vmem [shape: f32[64,1], index: 4, kind: input, shape index: {}]   ;;  %s1958_s5 = inlined_call_operand.vmem [shape: f32[32,64], index: 5, kind: input, shape index: {}]   ;;  %s1959_s6 = inlined_call_operand.vmem [shape: f32[32,1], index: 6, kind: input, shape index: {}]   ;;  %s1960_s7 = inlined_call_operand.vmem [shape: f32[3,32], index: 7, kind: input, shape index: {}]   ;;  %s1961_s8 = inlined_call_operand.vmem [shape: f32[2,3,256], index: 8, kind: output, shape index: {}]  }
   0x1   :  { %1964 = sst [smem:[#allocation10_spill]] %s1954_s1 }
   0x2   :  { %1965 = sst [smem:[#allocation11_spill]] %s1960_s7 }
   0x3   :  { %1966 = sst [smem:[#allocation12_spill]] %s1961_s8 }
   0x4   :  { %13 = vsyncpa [#allocation3], 0 }
   0x5   :  { %15 = vsyncpa [#allocation3 + $0x1], 0 }
   0x6   :  { %16 = vsyncpa [#allocation5], 0  ;;  %s1539_s27 = smov 0   ;;  %s1541_s28 = smov 0  }
   0x7   :  { %s1543_s29 = smov 0   ;;  %s1545_s30 = smov 0  }
   0x8   :  { %s1547_s9 = smov 0   ;;  %s1549_s10 = smov 0  }
   0x9 LB: > { %1967 = sst [smem:[#allocation8_spill]] %s1484_s9  ;;  %s1275_s11 = sadd.s32 4294967295, %s1488_s10   ;;  %s1488_s10 = sphi %s1549_s10, %s22_s10   ;;  %s1484_s9 = sphi %s1547_s9, %s1977_s9   ;;  %s1480_s30 = sphi %s1545_s30, %s1976_s30   ;;  %s1476_s29 = sphi %s1543_s29, %s1980_s29   ;;  %s1472_s28 = sphi %s1541_s28, %s1979_s28   ;;  %s1468_s27 = sphi %s1539_s27, %s1978_s27  }
   0xa   : > { %p56_p0 = scmp.ne.s32.totalorder %s1472_s28, %s1468_s27  ;;  %p1569_p1 = scmp.eq.s32.totalorder %s1275_s11, 0 }
   0xb   : > { %p1277_p2 = scmp.ge.s32.totalorder %s1488_s10, 1  ;;  %p242_p3 = scmp.lt.s32.totalorder %s1488_s10, 3 }
   0xc   : > { %p1577_p4 = por %p1569_p1, %p56_p0  ;;  %s1970_s1 = sld [smem:[#allocation10_spill]] }
   0xd   : > { %p1584_p5 = pnand %p1277_p2, %p242_p3  ;;  %s1490_s18 = smov [#allocation4]  }
   0xe   : > { %s255_s19 = sshll.u32 %s1490_s18, 4  ;;  %s1491_s20 = smov 256   ;;  %s256_s19 = int_to_ptr.vmem [resolvable:$true] %s255_s19 }
   0xf   : > { %p1308_p6 = pneg %p1584_p5  ;;  %s1492_s21 = smov 16  }
  0x10   : > { %s34_s22 = sadd.s32 1, %s1484_s9  ;;  %p50_p9 = scmp.ne.s32.totalorder %s1476_s29, %s1472_s28 }
  0x11   : > { %p1309_p7 = pnand %p1308_p6, %p1569_p1  ;;  %p36_p8 = scmp.ge.s32.totalorder %s34_s22, 2 }
  0x12   : > { %s253_s16 = sshll.u32 %s1970_s1, 4  ;;  %p51_p10 = scmp.eq.s32.totalorder %s1488_s10, 0  ;;  %s254_s16 = int_to_ptr.hbm [resolvable:$true] %s253_s16 }
  0x13   : > { %1311 = dma.hbm_to_vmem [thread:$0]  (!%p1309_p7), %s254_s16, 4096, %s256_s19, [#allocation5], %s1491_s20, %s1491_s20, %s1492_s21  }
  0x14   : > { %s1982_s22 = smov (%p36_p8, %s34_s22), 0  ;;  %s43_s23 = sadd.s32 1, %s1476_s29 }
  0x15   : > { %1972 = sst [smem:[#allocation9_spill]] %s1982_s22  ;;  %p1599_p11 = por %p51_p10, %p50_p9 }
  0x16   : > { %s38_s25 = ssub.s32 %s1484_s9, %s1982_s22  ;;  %s287_s26 = sand.u32 1, %s1476_s29  }
  0x17   : > { %p41_p12 = scmp.eq.s32.totalorder %s38_s25, 0  ;;  %p1317_p13 = scmp.lt.s32.totalorder %s1488_s10, 2 }
  0x18   : > { %s1280_s27 = sshll.u32 %s287_s26, 9  ;;  %s1300_s11 = sshll.u32 %s1484_s9, 9 }
  0x19   : > { %s1609_s14 = scalar_select %p41_p12, %s1476_s29, %s43_s23  }
  0x1a   : > { %s298_s18 = scalar_lea.hbm %s1953_s0, %s1300_s11  ;;  %s291_s1 = scalar_lea.vmem [#allocation2], %s1280_s27 }
  0x1b   : > { %s299_s19 = sshll.u32 %s298_s18, 4  ;;  %s301_s8 = sshll.u32 %s291_s1, 4  ;;  %s300_s19 = int_to_ptr.hbm [resolvable:$true] %s299_s19  ;;  %s302_s8 = int_to_ptr.vmem [resolvable:$true] %s301_s8 }
  0x1c   : > { %p1313_p0 = pnand %p1317_p13, %p1599_p11  ;;  %s288_s7 = scalar_lea.sflag [#allocation3], %s287_s26 }
  0x1d   : > { %313 = sbr.rel (%p1584_p5) target bundleno = 866 (0x362), region = 52  ;;  %s315_s23 = sand.u32 (!%p1584_p5), 1, %s1472_s28  }
  0x1e   : > { %1315 = dma.hbm_to_vmem [thread:$0]  (!%p1313_p0), %s300_s19, 8192, %s302_s8, %s288_s7, %s1491_s20, %s1491_s20, %s1492_s21  }
  0x1f   : > { %s1284_s25 = sshll.u32 (!%p1584_p5), %s315_s23, 9  ;;  %s316_s22 = scalar_lea.sflag (!%p1584_p5), [#allocation3], %s315_s23 }
  0x20   : > { %s1619_s9 = scalar_lea.vmem (!%p1584_p5), [#allocation2], %s1284_s25 }
  0x22   : > { %1459 = dma.done.wait (%p1577_p4), %s316_s22, 8192  }
  0x23   : > { %1461 = vsyncadd (%p1577_p4), %s316_s22, 4294959104 }
  0x24   : > { %1463 = dma.done.wait (%p1569_p1), [#allocation5], 4096  }
  0x25   : > { %1465 = vsyncadd (%p1569_p1), [#allocation5], 4294963200  ;;  %v1493_v0 = vmov 0   ;;  %v403_v1 = vld [vmem:[%s1619_s9 + $0xf0] sm:$0xff]  ;;  %v404_v2 = vld [vmem:[%s1619_s9 + $0xf8] sm:$0xff]  ;;  %vm1039_vm0 = vcmask 523264  }
  0x26   : > { %1371 = vset.pattern.permute.xlu0 %v1493_v0  ;;  %1372 = vset.pattern.permute.xlu1 %v1493_v0  ;;  %v401_v3 = vld [vmem:[%s1619_s9 + $0xe0] sm:$0xff]  ;;  %v435_v4 = vld [vmem:[%s1619_s9 + $0x1f0] sm:$0xff]  ;;  %v402_v5 = vld [vmem:[%s1619_s9 + $0xe8] sm:$0xff]  ;;  %s1974_s8 = sld [smem:[#allocation11_spill]]  ;;  %vm1119_vm1 = vcmask 261120   ;;  %p364_p1 = scmp.lt.s32.totalorder %s1480_s30, 1 }
  0x27   : > { %1373 = vset.pattern.permute.xlu2 %v1493_v0  ;;  %565 = vmatpush.msra.mxu0 %v403_v1  ;;  %v436_v6 = vld [vmem:[%s1619_s9 + $0x1f8] sm:$0xff]  ;;  %v399_v7 = vld [vmem:[%s1619_s9 + $0xd0] sm:$0xff]  ;;  %v433_v8 = vld [vmem:[%s1619_s9 + $0x1e0] sm:$0xff]  ;;  %vm1166_vm2 = vcmask 1043456   ;;  %s1975_s20 = sld [smem:[#allocation12_spill]] }
  0x28   : > { %695 = vmatpush.msra.mxu2 %v404_v2  ;;  %630 = vmatpush.msra.mxu1 %v435_v4  ;;  %v400_v9 = vld [vmem:[%s1619_s9 + $0xd8] sm:$0xff]  ;;  %v434_v10 = vld [vmem:[%s1619_s9 + $0x1e8] sm:$0xff]  ;;  %v431_v11 = vld [vmem:[%s1619_s9 + $0x1d0] sm:$0xff]  ;;  %s1984_s30 = smov (!%p364_p1, %s1480_s30), 1 }
  0x29   : > { %760 = vmatpush.msra.mxu3 %v436_v6  ;;  %566 = vmatpush.msra.mxu0 %v401_v3  ;;  %v397_v12 = vld [vmem:[%s1619_s9 + $0xc0] sm:$0xff]  ;;  %v398_v13 = vld [vmem:[%s1619_s9 + $0xc8] sm:$0xff]  ;;  %v432_v14 = vld [vmem:[%s1619_s9 + $0x1d8] sm:$0xff]  ;;  %s1301_s12 = sshll.u32 %s1984_s30, 3 }
  0x2a   : > { %696 = vmatpush.msra.mxu2 %v402_v5  ;;  %631 = vmatpush.msra.mxu1 %v433_v8  ;;  %v484_v15 = vld [vmem:[%s1955_s2 + $0x78] sm:$0xff]  ;;  %v429_v16 = vld [vmem:[%s1619_s9 + $0x1c0] sm:$0xff]  ;;  %v395_v17 = vld [vmem:[%s1619_s9 + $0xb0] sm:$0xff] }
  0x2b   : > { %761 = vmatpush.msra.mxu3 %v434_v10  ;;  %567 = vmatpush.msra.mxu0 %v399_v7  ;;  %v396_v18 = vld [vmem:[%s1619_s9 + $0xb8] sm:$0xff]  ;;  %v430_v19 = vld [vmem:[%s1619_s9 + $0x1c8] sm:$0xff]  ;;  %v427_v20 = vld [vmem:[%s1619_s9 + $0x1b0] sm:$0xff] }
  0x2c   : > { %697 = vmatpush.msra.mxu2 %v400_v9  ;;  %632 = vmatpush.msra.mxu1 %v431_v11  ;;  %v393_v21 = vld [vmem:[%s1619_s9 + $0xa0] sm:$0xff]  ;;  %v394_v22 = vld [vmem:[%s1619_s9 + $0xa8] sm:$0xff]  ;;  %v428_v23 = vld [vmem:[%s1619_s9 + $0x1b8] sm:$0xff] }
  0x2d   : > { %762 = vmatpush.msra.mxu3 %v432_v14  ;;  %568 = vmatpush.msra.mxu0 %v397_v12  ;;  %v425_v24 = vld [vmem:[%s1619_s9 + $0x1a0] sm:$0xff]  ;;  %v391_v25 = vld [vmem:[%s1619_s9 + $0x90] sm:$0xff]  ;;  %v392_v26 = vld [vmem:[%s1619_s9 + $0x98] sm:$0xff]  ;;  %s371_s21 = scalar_lea.vmem %s1975_s20, %s1301_s12 }
  0x2e   : > { %698 = vmatpush.msra.mxu2 %v398_v13  ;;  %562 = vperm.xlu0 %1371, %v484_v15   ;;  %v426_v27 = vld [vmem:[%s1619_s9 + $0x1a8] sm:$0xff]  ;;  %v423_v28 = vld [vmem:[%s1619_s9 + $0x190] sm:$0xff]  ;;  %v389_v29 = vld [vmem:[%s1619_s9 + $0x80] sm:$0xff] }
  0x2f   : > { %633 = vmatpush.msra.mxu1 %v429_v16  ;;  %569 = vmatpush.msra.mxu0 %v395_v17  ;;  %v390_v30 = vld [vmem:[%s1619_s9 + $0x88] sm:$0xff]  ;;  %v424_v31 = vld [vmem:[%s1619_s9 + $0x198] sm:$0xff]  ;;  %v483_v32 = vld [vmem:[%s1955_s2 + $0x70] sm:$0xff] }
  0x30   : > { %699 = vmatpush.msra.mxu2 %v396_v18  ;;  %763 = vmatpush.msra.mxu3 %v430_v19  ;;  %v387_v33 = vld [vmem:[%s1619_s9 + $0x70] sm:$0xff]  ;;  %v421_v34 = vld [vmem:[%s1619_s9 + $0x180] sm:$0xff]  ;;  %v388_v35 = vld [vmem:[%s1619_s9 + $0x78] sm:$0xff] }
  0x31   : > { %634 = vmatpush.msra.mxu1 %v427_v20  ;;  %570 = vmatpush.msra.mxu0 %v393_v21  ;;  %v422_v36 = vld [vmem:[%s1619_s9 + $0x188] sm:$0xff]  ;;  %v385_v37 = vld [vmem:[%s1619_s9 + $0x60] sm:$0xff]  ;;  %v419_v38 = vld [vmem:[%s1619_s9 + $0x170] sm:$0xff] }
  0x32   : > { %700 = vmatpush.msra.mxu2 %v394_v22  ;;  %764 = vmatpush.msra.mxu3 %v428_v23  ;;  %v386_v39 = vld [vmem:[%s1619_s9 + $0x68] sm:$0xff]  ;;  %v420_v40 = vld [vmem:[%s1619_s9 + $0x178] sm:$0xff]  ;;  %v383_v41 = vld [vmem:[%s1619_s9 + $0x50] sm:$0xff] }
  0x33   : > { %635 = vmatpush.msra.mxu1 %v425_v24  ;;  %571 = vmatpush.msra.mxu0 %v391_v25  ;;  %v417_v42 = vld [vmem:[%s1619_s9 + $0x160] sm:$0xff]  ;;  %v384_v43 = vld [vmem:[%s1619_s9 + $0x58] sm:$0xff]  ;;  %v418_v44 = vld [vmem:[%s1619_s9 + $0x168] sm:$0xff] }
  0x34   : > { %701 = vmatpush.msra.mxu2 %v392_v26  ;;  %765 = vmatpush.msra.mxu3 %v426_v27  ;;  %v381_v45 = vld [vmem:[%s1619_s9 + $0x40] sm:$0xff]  ;;  %v415_v46 = vld [vmem:[%s1619_s9 + $0x150] sm:$0xff]  ;;  %v382_v47 = vld [vmem:[%s1619_s9 + $0x48] sm:$0xff] }
  0x35   : > { %636 = vmatpush.msra.mxu1 %v423_v28  ;;  %572 = vmatpush.msra.mxu0 %v389_v29  ;;  %v416_v48 = vld [vmem:[%s1619_s9 + $0x158] sm:$0xff]  ;;  %v478_v49 = vld [vmem:[%s1955_s2 + $0x48] sm:$0xff]  ;;  %v379_v50 = vld [vmem:[%s1619_s9 + $0x30] sm:$0xff] }
  0x36   : > { %702 = vmatpush.msra.mxu2 %v390_v30  ;;  %766 = vmatpush.msra.mxu3 %v424_v31  ;;  %v413_v51 = vld [vmem:[%s1619_s9 + $0x140] sm:$0xff]  ;;  %v380_v52 = vld [vmem:[%s1619_s9 + $0x38] sm:$0xff]  ;;  %v414_v53 = vld [vmem:[%s1619_s9 + $0x148] sm:$0xff] }
  0x37   : > { %557 = vperm.xlu0 %1371, %v483_v32   ;;  %573 = vmatpush.msra.mxu0 %v387_v33  ;;  %v377_v54 = vld [vmem:[%s1619_s9 + $0x20] sm:$0xff]  ;;  %v411_v55 = vld [vmem:[%s1619_s9 + $0x130] sm:$0xff]  ;;  %v378_v56 = vld [vmem:[%s1619_s9 + $0x28] sm:$0xff] }
  0x38   : > { %637 = vmatpush.msra.mxu1 %v421_v34  ;;  %703 = vmatpush.msra.mxu2 %v388_v35  ;;  %v412_v57 = vld [vmem:[%s1619_s9 + $0x138] sm:$0xff]  ;;  %v375_v58 = vld [vmem:[%s1619_s9 + $0x10] sm:$0xff]  ;;  %v409_v59 = vld [vmem:[%s1619_s9 + $0x120] sm:$0xff] }
  0x39   : > { %767 = vmatpush.msra.mxu3 %v422_v36  ;;  %574 = vmatpush.msra.mxu0 %v385_v37  ;;  %v376_v60 = vld [vmem:[%s1619_s9 + $0x18] sm:$0xff]  ;;  %v410_v61 = vld [vmem:[%s1619_s9 + $0x128] sm:$0xff]  ;;  %v373_v62 = vld [vmem:[%s1619_s9] sm:$0xff] }
  0x3a   : > { %638 = vmatpush.msra.mxu1 %v419_v38  ;;  %704 = vmatpush.msra.mxu2 %v386_v39  ;;  %v407_v63 = vld [vmem:[%s1619_s9 + $0x110] sm:$0xff]  ;;  %v374_v0 = vld [vmem:[%s1619_s9 + $0x8] sm:$0xff]  ;;  %v408_v1 = vld [vmem:[%s1619_s9 + $0x118] sm:$0xff] }
  0x3b   : > { %768 = vmatpush.msra.mxu3 %v420_v40  ;;  %575 = vmatpush.msra.mxu0 %v383_v41  ;;  %v437_v2 = vld [vmem:[#allocation4] sm:$0xff]  ;;  %v482_v3 = vld [vmem:[%s1955_s2 + $0x68] sm:$0xff]  ;;  %v475_v4 = vld [vmem:[%s1955_s2 + $0x30] sm:$0xff] }
  0x3c   : > { %639 = vmatpush.msra.mxu1 %v417_v42  ;;  %705 = vmatpush.msra.mxu2 %v384_v43  ;;  %v405_v5 = vld [vmem:[%s1619_s9 + $0x100] sm:$0xff]  ;;  %v406_v6 = vld [vmem:[%s1619_s9 + $0x108] sm:$0xff]  ;;  %v480_v8 = vld [vmem:[%s1955_s2 + $0x58] sm:$0xff] }
  0x3d   : > { %769 = vmatpush.msra.mxu3 %v418_v44  ;;  %576 = vmatpush.msra.mxu0 %v381_v45  ;;  %v438_v7 = vld [vmem:[#allocation4 + $0x8] sm:$0xff]  ;;  %v439_v9 = vld [vmem:[#allocation4 + $0x10] sm:$0xff]  ;;  %v481_v10 = vld [vmem:[%s1955_s2 + $0x60] sm:$0xff] }
  0x3e   : > { %640 = vmatpush.msra.mxu1 %v415_v46  ;;  %706 = vmatpush.msra.mxu2 %v382_v47  ;;  %v472_v11 = vld [vmem:[%s1955_s2 + $0x18] sm:$0xff]  ;;  %v479_v13 = vld [vmem:[%s1955_s2 + $0x50] sm:$0xff]  ;;  %v441_v14 = vld [vmem:[#allocation4 + $0x20] sm:$0xff] }
  0x3f   : > { %770 = vmatpush.msra.mxu3 %v416_v48  ;;  %532 = vperm.xlu0 %1371, %v478_v49   ;;  %v440_v12 = vld [vmem:[#allocation4 + $0x18] sm:$0xff]  ;;  %v477_v15 = vld [vmem:[%s1955_s2 + $0x40] sm:$0xff]  ;;  %v442_v17 = vld [vmem:[#allocation4 + $0x28] sm:$0xff] }
  0x40   : > { %577 = vmatpush.msra.mxu0 %v379_v50  ;;  %641 = vmatpush.msra.mxu1 %v413_v51  ;;  %v469_v16 = vld [vmem:[%s1955_s2] sm:$0xff]  ;;  %v476_v18 = vld [vmem:[%s1955_s2 + $0x38] sm:$0xff]  ;;  %v443_v19 = vld [vmem:[#allocation4 + $0x30] sm:$0xff] }
  0x41   : > { %707 = vmatpush.msra.mxu2 %v380_v52  ;;  %771 = vmatpush.msra.mxu3 %v414_v53  ;;  %v474_v20 = vld [vmem:[%s1955_s2 + $0x28] sm:$0xff]  ;;  %v444_v21 = vld [vmem:[#allocation4 + $0x38] sm:$0xff]  ;;  %v473_v22 = vld [vmem:[%s1955_s2 + $0x20] sm:$0xff] }
  0x42   : > { %578 = vmatpush.msra.mxu0 %v377_v54  ;;  %642 = vmatpush.msra.mxu1 %v411_v55  ;;  %v445_v23 = vld [vmem:[#allocation4 + $0x40] sm:$0xff]  ;;  %v471_v24 = vld [vmem:[%s1955_s2 + $0x10] sm:$0xff]  ;;  %v446_v25 = vld [vmem:[#allocation4 + $0x48] sm:$0xff] }
  0x43   : > { %708 = vmatpush.msra.mxu2 %v378_v56  ;;  %772 = vmatpush.msra.mxu3 %v412_v57  ;;  %v470_v26 = vld [vmem:[%s1955_s2 + $0x8] sm:$0xff]  ;;  %v447_v27 = vld [vmem:[#allocation4 + $0x50] sm:$0xff]  ;;  %v448_v28 = vld [vmem:[#allocation4 + $0x58] sm:$0xff] }
  0x44   : > { %579 = vmatpush.msra.mxu0 %v375_v58  ;;  %643 = vmatpush.msra.mxu1 %v409_v59  ;;  %v449_v29 = vld [vmem:[#allocation4 + $0x60] sm:$0xff]  ;;  %v450_v30 = vld [vmem:[#allocation4 + $0x68] sm:$0xff]  ;;  %v451_v31 = vld [vmem:[#allocation4 + $0x70] sm:$0xff] }
  0x45   : > { %709 = vmatpush.msra.mxu2 %v376_v60  ;;  %773 = vmatpush.msra.mxu3 %v410_v61  ;;  %v452_v32 = vld [vmem:[#allocation4 + $0x78] sm:$0xff]  ;;  %v453_v33 = vld [vmem:[#allocation4 + $0x80] sm:$0xff]  ;;  %v454_v34 = vld [vmem:[#allocation4 + $0x88] sm:$0xff] }
  0x46   : > { %580 = vmatpush.msra.mxu0 %v373_v62  ;;  %644 = vmatpush.msra.mxu1 %v407_v63  ;;  %v870_v35 = vld [vmem:[%s1957_s4 + $0x28] sm:$0xff]  ;;  %v455_v36 = vld [vmem:[#allocation4 + $0x90] sm:$0xff]  ;;  %v456_v37 = vld [vmem:[#allocation4 + $0x98] sm:$0xff] }
  0x47   : > { %710 = vmatpush.msra.mxu2 %v374_v0  ;;  %774 = vmatpush.msra.mxu3 %v408_v1  ;;  %v872_v38 = vld [vmem:[%s1957_s4 + $0x38] sm:$0xff]  ;;  %v867_v39 = vld [vmem:[%s1957_s4 + $0x10] sm:$0xff]  ;;  %v457_v40 = vld [vmem:[#allocation4 + $0xa0] sm:$0xff] }
  0x48   : > { %581 = vmatmul.f32.vlgmr.msra.gmra.mxu0 %v437_v2  ;;  %711 = vmatmul.f32.vlgmr.msra.gmra.mxu2 %v437_v2  ;;  %v458_v41 = vld [vmem:[#allocation4 + $0xa8] sm:$0xff]  ;;  %v869_v42 = vld [vmem:[%s1957_s4 + $0x20] sm:$0xff]  ;;  %v1018_v43 = vld [vmem:[%s1959_s6 + $0x18] sm:$0xff] }
  0x49   : > { %552 = vperm.xlu1 %1372, %v482_v3   ;;  %517 = vperm.xlu0 %1371, %v475_v4   ;;  %v459_v44 = vld [vmem:[#allocation4 + $0xb0] sm:$0xff]  ;;  %v460_v45 = vld [vmem:[#allocation4 + $0xb8] sm:$0xff]  ;;  %v866_v47 = vld [vmem:[%s1957_s4 + $0x8] sm:$0xff] }
  0x4a   : > { %645 = vmatpush.msra.mxu1 %v405_v5  ;;  %775 = vmatpush.msra.mxu3 %v406_v6  ;;  %v461_v48 = vld [vmem:[#allocation4 + $0xc0] sm:$0xff]  ;;  %v462_v51 = vld [vmem:[#allocation4 + $0xc8] sm:$0xff]  ;;  %v1017_v53 = vld [vmem:[%s1959_s6 + $0x10] sm:$0xff] }
  0x4b   : > { %646 = vmatmul.f32.vlgmr.msra.gmra.mxu1 %v438_v7  ;;  %776 = vmatmul.f32.vlgmr.msra.gmra.mxu3 %v438_v7  ;;  %v1015_v49 = vld [vmem:[%s1959_s6] sm:$0xff]  ;;  %v463_v54 = vld [vmem:[#allocation4 + $0xd0] sm:$0xff]  ;;  %v464_v57 = vld [vmem:[#allocation4 + $0xd8] sm:$0xff] }
  0x4c   : > { %542 = vperm.xlu2 %1373, %v480_v8   ;;  %v871_v55 = vld [vmem:[%s1957_s4 + $0x30] sm:$0xff]  ;;  %v465_v59 = vld [vmem:[#allocation4 + $0xe0] sm:$0xff]  ;;  %v868_v60 = vld [vmem:[%s1957_s4 + $0x18] sm:$0xff] }
  0x4d   : > { %v466_v61 = vld [vmem:[#allocation4 + $0xe8] sm:$0xff]  ;;  %v467_v1 = vld [vmem:[#allocation4 + $0xf0] sm:$0xff]  ;;  %v865_v2 = vld [vmem:[%s1957_s4] sm:$0xff] }
  0x4e   : > { %v468_v3 = vld [vmem:[#allocation4 + $0xf8] sm:$0xff]  ;;  %v1016_v8 = vld [vmem:[%s1959_s6 + $0x8] sm:$0xff] }
  0x50   : > { %584 = vmatmul.f32.gmra.mxu0 %v439_v9  ;;  %714 = vmatmul.f32.gmra.mxu2 %v439_v9 }
  0x51   : > { %547 = vperm.xlu1 %1372, %v481_v10   ;;  %502 = vperm.xlu0 %1371, %v472_v11  }
  0x53   : > { %649 = vmatmul.f32.gmra.mxu1 %v440_v12  ;;  %779 = vmatmul.f32.gmra.mxu3 %v440_v12 }
  0x54   : > { %537 = vperm.xlu2 %1373, %v479_v13  }
  0x58   : > { %587 = vmatmul.f32.gmra.mxu0 %v441_v14  ;;  %717 = vmatmul.f32.gmra.mxu2 %v441_v14 }
  0x59   : > { %527 = vperm.xlu1 %1372, %v477_v15   ;;  %487 = vperm.xlu0 %1371, %v469_v16  }
  0x5b   : > { %652 = vmatmul.f32.gmra.mxu1 %v442_v17  ;;  %782 = vmatmul.f32.gmra.mxu3 %v442_v17 }
  0x5c   : > { %522 = vperm.xlu2 %1373, %v476_v18  }
  0x60   : > { %590 = vmatmul.f32.gmra.mxu0 %v443_v19  ;;  %720 = vmatmul.f32.gmra.mxu2 %v443_v19 }
  0x61   : > { %512 = vperm.xlu1 %1372, %v474_v20   ;;  %900 = vperm.xlu0 %1371, %v870_v35  }
  0x63   : > { %655 = vmatmul.f32.gmra.mxu1 %v444_v21  ;;  %785 = vmatmul.f32.gmra.mxu3 %v444_v21 }
  0x64   : > { %507 = vperm.xlu2 %1373, %v473_v22  }
  0x68   : > { %593 = vmatmul.f32.gmra.mxu0 %v445_v23  ;;  %723 = vmatmul.f32.gmra.mxu2 %v445_v23 }
  0x69   : > { %497 = vperm.xlu1 %1372, %v471_v24   ;;  %885 = vperm.xlu0 %1371, %v867_v39  }
  0x6b   : > { %658 = vmatmul.f32.gmra.mxu1 %v446_v25  ;;  %788 = vmatmul.f32.gmra.mxu3 %v446_v25 }
  0x6c   : > { %492 = vperm.xlu2 %1373, %v470_v26  }
  0x70   : > { %596 = vmatmul.f32.gmra.mxu0 %v447_v27  ;;  %726 = vmatmul.f32.gmra.mxu2 %v447_v27 }
  0x71   : > { %910 = vperm.xlu1 %1372, %v872_v38   ;;  %1036 = vperm.xlu0 %1371, %v1018_v43  }
  0x73   : > { %661 = vmatmul.f32.gmra.mxu1 %v448_v28  ;;  %791 = vmatmul.f32.gmra.mxu3 %v448_v28 }
  0x74   : > { %905 = vperm.xlu2 %1373, %v871_v55  }
  0x78   : > { %599 = vmatmul.f32.gmra.mxu0 %v449_v29  ;;  %729 = vmatmul.f32.gmra.mxu2 %v449_v29 }
  0x79   : > { %895 = vperm.xlu1 %1372, %v869_v42   ;;  %1021 = vperm.xlu0 %1371, %v1015_v49  }
  0x7b   : > { %664 = vmatmul.f32.gmra.mxu1 %v450_v30  ;;  %794 = vmatmul.f32.gmra.mxu3 %v450_v30 }
  0x7c   : > { %890 = vperm.xlu2 %1373, %v868_v60  }
  0x80   : > { %602 = vmatmul.f32.gmra.mxu0 %v451_v31  ;;  %732 = vmatmul.f32.gmra.mxu2 %v451_v31 }
  0x81   : > { %880 = vperm.xlu1 %1372, %v866_v47  }
  0x83   : > { %667 = vmatmul.f32.gmra.mxu1 %v452_v32  ;;  %797 = vmatmul.f32.gmra.mxu3 %v452_v32 }
  0x84   : > { %875 = vperm.xlu2 %1373, %v865_v2  }
  0x88   : > { %605 = vmatmul.f32.gmra.mxu0 %v453_v33  ;;  %735 = vmatmul.f32.gmra.mxu2 %v453_v33 }
  0x89   : > { %1031 = vperm.xlu1 %1372, %v1017_v53  }
  0x8b   : > { %670 = vmatmul.f32.gmra.mxu1 %v454_v34  ;;  %800 = vmatmul.f32.gmra.mxu3 %v454_v34 }
  0x8c   : > { %1026 = vperm.xlu2 %1373, %v1016_v8  }
  0x90   : > { %608 = vmatmul.f32.gmra.mxu0 %v455_v36  ;;  %738 = vmatmul.f32.gmra.mxu2 %v455_v36 }
  0x93   : > { %673 = vmatmul.f32.gmra.mxu1 %v456_v37  ;;  %803 = vmatmul.f32.gmra.mxu3 %v456_v37 }
  0x98   : > { %611 = vmatmul.f32.gmra.mxu0 %v457_v40  ;;  %741 = vmatmul.f32.gmra.mxu2 %v457_v40 }
  0x9b   : > { %676 = vmatmul.f32.gmra.mxu1 %v458_v41  ;;  %806 = vmatmul.f32.gmra.mxu3 %v458_v41 }
  0xa0   : > { %614 = vmatmul.f32.gmra.mxu0 %v459_v44  ;;  %744 = vmatmul.f32.gmra.mxu2 %v459_v44  ;;  %v1756_v46 = vpop.permute.xlu0 %562 }
  0xa3   : > { %679 = vmatmul.f32.gmra.mxu1 %v460_v45  ;;  %809 = vmatmul.f32.gmra.mxu3 %v460_v45 }
  0xa6   : > { %v1764_v50 = vpop.permute.xlu2 %542 }
  0xa8   : > { %617 = vmatmul.f32.gmra.mxu0 %v461_v48  ;;  %747 = vmatmul.f32.gmra.mxu2 %v461_v48 }
  0xa9   : > { %v1766_v52 = vpop.permute.xlu0 %557 }
  0xab   : > { %682 = vmatmul.f32.gmra.mxu1 %v462_v51  ;;  %812 = vmatmul.f32.gmra.mxu3 %v462_v51 }
  0xae   : > { %v1774_v56 = vpop.permute.xlu2 %537 }
  0xb0   : > { %620 = vmatmul.f32.gmra.mxu0 %v463_v54  ;;  %750 = vmatmul.f32.gmra.mxu2 %v463_v54 }
  0xb1   : > { %v1776_v58 = vpop.permute.xlu0 %532 }
  0xb3   : > { %685 = vmatmul.f32.gmra.mxu1 %v464_v57  ;;  %815 = vmatmul.f32.gmra.mxu3 %v464_v57 }
  0xb6   : > { %v1781_v62 = vpop.permute.xlu2 %522 }
  0xb8   : > { %623 = vmatmul.f32.gmra.mxu0 %v465_v59  ;;  %753 = vmatmul.f32.gmra.mxu2 %v465_v59 }
  0xbb   : > { %688 = vmatmul.f32.gmra.mxu1 %v466_v61  ;;  %v1783_v63 = vpop.permute.xlu1 %552  ;;  %818 = vmatmul.f32.gmra.mxu3 %v466_v61  ;;  %v1785_v0 = vpop.permute.xlu0 %517 }
  0xbe   : > { %v508_v5 = vpop.permute.xlu2 %507 }
  0xc0   : > { %626 = vmatmul.f32.gmra.mxu0 %v467_v1  ;;  %756 = vmatmul.f32.gmra.mxu2 %v467_v1 }
  0xc3   : > { %691 = vmatmul.f32.gmra.mxu1 %v468_v3  ;;  %v1790_v4 = vpop.permute.xlu1 %547  ;;  %821 = vmatmul.f32.gmra.mxu3 %v468_v3  ;;  %v503_v6 = vpop.permute.xlu0 %502 }
  0xc5   : > { %v582_v7 = vpop.f32.mrf.mxu0 }
  0xc6   : > { %v493_v16 = vpop.permute.xlu2 %492 }
  0xc8   : > { %v647_v9 = vpop.f32.mrf.mxu1 }
  0xcb   : > { %v1795_v10 = vpop.permute.xlu1 %527  ;;  %v488_v11 = vpop.permute.xlu0 %487 }
  0xcc   : > { %v712_v12 = vpop.f32.mrf.mxu2  ;;  %v583_v13 = vadd.f32 %v582_v7, %v488_v11 }
  0xcd   : > { %v713_v14 = vadd.f32 %v712_v12, %v488_v11  ;;  %v585_v15 = vpop.f32.mrf.mxu0 }
  0xce   : > { %v586_v17 = vadd.f32 %v585_v15, %v493_v16  ;;  %v777_v18 = vpop.f32.mrf.mxu3  ;;  %v1797_v19 = vadd.f32 %v647_v9, %v583_v13 }
  0xcf   : > { %v1799_v20 = vadd.f32 %v777_v18, %v713_v14 }
  0xd0   : > { %v650_v21 = vpop.f32.mrf.mxu1 }
  0xd1   : > { %v1801_v22 = vadd.f32 %v650_v21, %v586_v17 }
  0xd3   : > { %v513_v23 = vpop.permute.xlu1 %512 }
  0xd4   : > { %v715_v24 = vpop.f32.mrf.mxu2 }
  0xd5   : > { %v716_v25 = vadd.f32 %v715_v24, %v493_v16  ;;  %v588_v26 = vpop.f32.mrf.mxu0 }
  0xd6   : > { %v780_v27 = vpop.f32.mrf.mxu3 }
  0xd7   : > { %v1803_v28 = vadd.f32 %v780_v27, %v716_v25 }
  0xd8   : > { %v653_v29 = vpop.f32.mrf.mxu1 }
  0xdb   : > { %v498_v30 = vpop.permute.xlu1 %497 }
  0xdc   : > { %v589_v31 = vadd.f32 %v588_v26, %v498_v30  ;;  %v718_v32 = vpop.f32.mrf.mxu2 }
  0xdd   : > { %v719_v33 = vadd.f32 %v718_v32, %v498_v30  ;;  %v591_v34 = vpop.f32.mrf.mxu0 }
  0xde   : > { %v592_v35 = vadd.f32 %v591_v34, %v503_v6  ;;  %v1805_v36 = vadd.f32 %v653_v29, %v589_v31  ;;  %v783_v37 = vpop.f32.mrf.mxu3 }
  0xdf   : > { %v1807_v38 = vadd.f32 %v783_v37, %v719_v33 }
  0xe0   : > { %v656_v39 = vpop.f32.mrf.mxu1 }
  0xe1   : > { %v1809_v40 = vadd.f32 %v656_v39, %v592_v35 }
  0xe4   : > { %v721_v41 = vpop.f32.mrf.mxu2 }
  0xe5   : > { %v722_v42 = vadd.f32 %v721_v41, %v503_v6  ;;  %v594_v43 = vpop.f32.mrf.mxu0 }
  0xe6   : > { %v595_v44 = vadd.f32 %v594_v43, %v508_v5  ;;  %v786_v45 = vpop.f32.mrf.mxu3 }
  0xe7   : > { %v1811_v47 = vadd.f32 %v786_v45, %v722_v42 }
  0xe8   : > { %v659_v48 = vpop.f32.mrf.mxu1 }
  0xe9   : > { %v1813_v49 = vadd.f32 %v659_v48, %v595_v44 }
  0xec   : > { %v724_v51 = vpop.f32.mrf.mxu2 }
  0xed   : > { %v725_v53 = vadd.f32 %v724_v51, %v508_v5  ;;  %v597_v54 = vpop.f32.mrf.mxu0 }
  0xee   : > { %v598_v55 = vadd.f32 %v597_v54, %v513_v23  ;;  %v789_v57 = vpop.f32.mrf.mxu3 }
  0xef   : > { %v1815_v59 = vadd.f32 %v789_v57, %v725_v53 }
  0xf0   : > { %v662_v60 = vpop.f32.mrf.mxu1 }
  0xf1   : > { %v1817_v61 = vadd.f32 %v662_v60, %v598_v55 }
  0xf4   : > { %v727_v1 = vpop.f32.mrf.mxu2 }
  0xf5   : > { %v728_v2 = vadd.f32 %v727_v1, %v513_v23  ;;  %v600_v3 = vpop.f32.mrf.mxu0 }
  0xf6   : > { %v601_v6 = vadd.f32 %v600_v3, %v1785_v0  ;;  %v792_v7 = vpop.f32.mrf.mxu3 }
  0xf7   : > { %v1820_v8 = vadd.f32 %v792_v7, %v728_v2 }
  0xf8   : > { %v665_v9 = vpop.f32.mrf.mxu1 }
  0xf9   : > { %v1822_v11 = vadd.f32 %v665_v9, %v601_v6 }
  0xfc   : > { %v730_v5 = vpop.f32.mrf.mxu2 }
  0xfd   : > { %v731_v12 = vadd.f32 %v730_v5, %v1785_v0  ;;  %v603_v13 = vpop.f32.mrf.mxu0 }
  0xfe   : > { %v604_v14 = vadd.f32 %v603_v13, %v1781_v62  ;;  %v795_v15 = vpop.f32.mrf.mxu3 }
  0xff   : > { %v1826_v16 = vadd.f32 %v795_v15, %v731_v12 }
 0x100   : > { %v668_v17 = vpop.f32.mrf.mxu1 }
 0x101   : > { %v1828_v18 = vadd.f32 %v668_v17, %v604_v14 }
 0x104   : > { %v733_v21 = vpop.f32.mrf.mxu2 }
 0x105   : > { %v734_v23 = vadd.f32 %v733_v21, %v1781_v62  ;;  %v606_v24 = vpop.f32.mrf.mxu0 }
 0x106   : > { %v607_v25 = vadd.f32 %v606_v24, %v1795_v10  ;;  %v798_v26 = vpop.f32.mrf.mxu3 }
 0x107   : > { %v1832_v27 = vadd.f32 %v798_v26, %v734_v23 }
 0x108   : > { %v671_v29 = vpop.f32.mrf.mxu1 }
 0x109   : > { %v1834_v0 = vadd.f32 %v671_v29, %v607_v25 }
 0x10c   : > { %v736_v30 = vpop.f32.mrf.mxu2 }
 0x10d   : > { %v737_v31 = vadd.f32 %v736_v30, %v1795_v10  ;;  %v609_v32 = vpop.f32.mrf.mxu0 }
 0x10e   : > { %v801_v33 = vpop.f32.mrf.mxu3 }
 0x10f   : > { %v1837_v34 = vadd.f32 %v801_v33, %v737_v31 }
 0x110   : > { %v674_v35 = vpop.f32.mrf.mxu1 }
 0x114   : > { %v1839_v37 = vpop.f32.mrf.mxu2 }
 0x115   : > { %v612_v62 = vpop.f32.mrf.mxu0 }
 0x116   : > { %v1841_v39 = vpop.f32.mrf.mxu3  ;;  %v613_v31 = vadd.f32 %v612_v62, %v1774_v56 }
 0x118   : > { %v677_v41 = vpop.f32.mrf.mxu1 }
 0x11c   : > { %v742_v42 = vpop.f32.mrf.mxu2 }
 0x11d   : > { %v615_v43 = vpop.f32.mrf.mxu0 }
 0x11e   : > { %v1843_v44 = vpop.f32.mrf.mxu3  ;;  %v616_v24 = vadd.f32 %v615_v43, %v1764_v50 }
 0x120   : > { %v680_v45 = vpop.f32.mrf.mxu1 }
 0x124   : > { %v745_v48 = vpop.f32.mrf.mxu2 }
 0x125   : > { %v618_v51 = vpop.f32.mrf.mxu0  ;;  %v746_v62 = vadd.f32 %v745_v48, %v1764_v50  ;;  %v841_v48 = vmax.f32 %v1834_v0, 0.0  ;;  %v842_v0 = vmax.f32 %v1837_v34, 0.0  ;;  %v827_v34 = vmax.f32 %v1801_v22, 0.0 }
 0x126   : > { %v810_v53 = vpop.f32.mrf.mxu3  ;;  %v619_v17 = vadd.f32 %v618_v51, %v1790_v4  ;;  %v610_v51 = vadd.f32 %v609_v32, %v1776_v58  ;;  %v828_v22 = vmax.f32 %v1803_v28, 0.0  ;;  %v860_v28 = vld [vmem:[%s1956_s3 + $0x18] sm:$0xff] }
 0x128   : > { %v683_v10 = vpop.f32.mrf.mxu1 }
 0x129   : > { %v684_v33 = vadd.f32 %v683_v10, %v619_v17 }
 0x12c   : > { %v748_v54 = vpop.f32.mrf.mxu2 }
 0x12d   : > { %v621_v55 = vpop.f32.mrf.mxu0  ;;  %v749_v43 = vadd.f32 %v748_v54, %v1790_v4  ;;  %v740_v4 = vadd.f32 %v1839_v37, %v1776_v58  ;;  %v837_v37 = vmax.f32 %v1822_v11, 0.0  ;;  %v838_v11 = vmax.f32 %v1826_v16, 0.0 }
 0x12e   : > { %v813_v57 = vpop.f32.mrf.mxu3  ;;  %v622_v13 = vadd.f32 %v621_v55, %v1783_v63  ;;  %v832_v16 = vmax.f32 %v1811_v47, 0.0  ;;  %v859_v47 = vld [vmem:[%s1956_s3 + $0x10] sm:$0xff] }
 0x12f   : > { %v814_v32 = vadd.f32 %v813_v57, %v749_v43  ;;  %v839_v57 = vmax.f32 %v1828_v18, 0.0  ;;  %v831_v18 = vmax.f32 %v1809_v40, 0.0  ;;  %v857_v40 = vld [vmem:[%s1956_s3] sm:$0xff] }
 0x130   : > { %v686_v60 = vpop.f32.mrf.mxu1 }
 0x131   : > { %v687_v25 = vadd.f32 %v686_v60, %v622_v13  ;;  %v849_v13 = vmax.f32 %v684_v33, 0.0 }
 0x134   : > { %v751_v1 = vpop.f32.mrf.mxu2 }
 0x135   : > { %v624_v2 = vpop.f32.mrf.mxu0  ;;  %v752_v55 = vadd.f32 %v751_v1, %v1783_v63  ;;  %v743_v63 = vadd.f32 %v742_v42, %v1774_v56  ;;  %v805_v56 = vadd.f32 %v1841_v39, %v740_v4  ;;  %v833_v39 = vmax.f32 %v1813_v49, 0.0 }
 0x136   : > { %v816_v3 = vpop.f32.mrf.mxu3  ;;  %v625_v9 = vadd.f32 %v624_v2, %v1766_v52  ;;  %v834_v49 = vmax.f32 %v1815_v59, 0.0  ;;  %v826_v59 = vmax.f32 %v1799_v20, 0.0  ;;  %v861_v20 = vld [vmem:[%s1956_s3 + $0x20] sm:$0xff] }
 0x137   : > { %v817_v10 = vadd.f32 %v816_v3, %v752_v55  ;;  %v808_v50 = vadd.f32 %v1843_v44, %v743_v63  ;;  %v835_v44 = vmax.f32 %v1817_v61, 0.0  ;;  %v840_v3 = vmax.f32 %v1832_v27, 0.0 }
 0x138   : > { %v689_v6 = vpop.f32.mrf.mxu1  ;;  %v836_v61 = vmax.f32 %v1820_v8, 0.0  ;;  %v825_v27 = vmax.f32 %v1797_v19, 0.0  ;;  %v858_v19 = vld [vmem:[%s1956_s3 + $0x8] sm:$0xff]  ;;  %v863_v8 = vld [vmem:[%s1956_s3 + $0x30] sm:$0xff] }
 0x139   : > { %v690_v21 = vadd.f32 %v689_v6, %v625_v9  ;;  %v681_v6 = vadd.f32 %v680_v45, %v616_v24  ;;  %v851_v9 = vmax.f32 %v687_v25, 0.0  ;;  %v852_v54 = vmax.f32 %v817_v10, 0.0 }
 0x13a   : > { %v846_v58 = vmax.f32 %v808_v50, 0.0 }
 0x13b   : > { %v853_v2 = vmax.f32 %v690_v21, 0.0  ;;  %v847_v17 = vmax.f32 %v681_v6, 0.0  ;;  %v829_v21 = vmax.f32 %v1805_v36, 0.0  ;;  %v830_v36 = vmax.f32 %v1807_v38, 0.0  ;;  %v862_v38 = vld [vmem:[%s1956_s3 + $0x28] sm:$0xff]  ;;  %v911_v6 = vpop.permute.xlu1 %910 }
 0x13c   : > { %v754_v7 = vpop.f32.mrf.mxu2 }
 0x13d   : > { %v627_v5 = vpop.f32.mrf.mxu0  ;;  %v755_v29 = vadd.f32 %v754_v7, %v1766_v52  ;;  %v678_v7 = vadd.f32 %v677_v41, %v613_v31  ;;  %v811_v41 = vadd.f32 %v810_v53, %v746_v62  ;;  %v844_v53 = vmax.f32 %v805_v56, 0.0 }
 0x13e   : > { %v628_v12 = vadd.f32 %v627_v5, %v1756_v46  ;;  %v819_v14 = vpop.f32.mrf.mxu3 }
 0x13f   : > { %v820_v60 = vadd.f32 %v819_v14, %v755_v29  ;;  %v845_v1 = vmax.f32 %v678_v7, 0.0  ;;  %v848_v42 = vmax.f32 %v811_v41, 0.0 }
 0x140   : > { %v692_v15 = vpop.f32.mrf.mxu1 }
 0x141   : > { %v693_v23 = vadd.f32 %v692_v15, %v628_v12  ;;  %v675_v15 = vadd.f32 %v674_v35, %v610_v51  ;;  %v854_v45 = vmax.f32 %v820_v60, 0.0  ;;  %v850_v35 = vmax.f32 %v814_v32, 0.0  ;;  %v901_v60 = vpop.permute.xlu0 %900 }
 0x143   : > { %v855_v26 = vmax.f32 %v693_v23, 0.0  ;;  %v843_v14 = vmax.f32 %v675_v15, 0.0  ;;  %v864_v23 = vld [vmem:[%s1956_s3 + $0x38] sm:$0xff]  ;;  %v896_v7 = vpop.permute.xlu1 %895 }
 0x144   : > { %v757_v30 = vpop.f32.mrf.mxu2 }
 0x145   : > { %v758_v5 = vadd.f32 %v757_v30, %v1756_v46  ;;  %913 = vmatpush.msrb.mxu0 %v855_v26 }
 0x146   : > { %v822_v12 = vpop.f32.mrf.mxu3 }
 0x147   : > { %914 = vmatpush.msrb.mxu0 %v853_v2  ;;  %v823_v52 = vadd.f32 %v822_v12, %v758_v5  ;;  %v906_v12 = vpop.permute.xlu2 %905 }
 0x149   : > { %915 = vmatpush.msrb.mxu0 %v851_v9  ;;  %v856_v46 = vmax.f32 %v823_v52, 0.0  ;;  %v886_v41 = vpop.permute.xlu0 %885 }
 0x14b   : > { %916 = vmatpush.msrb.mxu0 %v849_v13  ;;  %954 = vmatpush.msrb.mxu1 %v856_v46 }
 0x14d   : > { %917 = vmatpush.msrb.mxu0 %v847_v17  ;;  %955 = vmatpush.msrb.mxu1 %v854_v45 }
 0x14f   : > { %918 = vmatpush.msrb.mxu0 %v845_v1  ;;  %956 = vmatpush.msrb.mxu1 %v852_v54  ;;  %v891_v46 = vpop.permute.xlu2 %890 }
 0x151   : > { %919 = vmatpush.msrb.mxu0 %v843_v14  ;;  %957 = vmatpush.msrb.mxu1 %v850_v35 }
 0x153   : > { %920 = vmatpush.msrb.mxu0 %v841_v48  ;;  %958 = vmatpush.msrb.mxu1 %v848_v42  ;;  %v881_v48 = vpop.permute.xlu1 %880 }
 0x155   : > { %921 = vmatpush.msrb.mxu0 %v839_v57  ;;  %959 = vmatpush.msrb.mxu1 %v846_v58 }
 0x157   : > { %922 = vmatpush.msrb.mxu0 %v837_v37  ;;  %960 = vmatpush.msrb.mxu1 %v844_v53  ;;  %v876_v37 = vpop.permute.xlu2 %875 }
 0x159   : > { %923 = vmatpush.msrb.mxu0 %v835_v44  ;;  %961 = vmatpush.msrb.mxu1 %v842_v0 }
 0x15b   : > { %924 = vmatpush.msrb.mxu0 %v833_v39  ;;  %962 = vmatpush.msrb.mxu1 %v840_v3 }
 0x15d   : > { %925 = vmatpush.msrb.mxu0 %v831_v18  ;;  %963 = vmatpush.msrb.mxu1 %v838_v11 }
 0x15f   : > { %926 = vmatpush.msrb.mxu0 %v829_v21  ;;  %964 = vmatpush.msrb.mxu1 %v836_v61 }
 0x161   : > { %927 = vmatpush.msrb.mxu0 %v827_v34  ;;  %965 = vmatpush.msrb.mxu1 %v834_v49  ;;  %v1011_v49 = vld [vmem:[%s1958_s5] sm:$0xff] }
 0x163   : > { %928 = vmatpush.msrb.mxu0 %v825_v27  ;;  %966 = vmatpush.msrb.mxu1 %v832_v16 }
 0x164   : > { %929 = vmatmul.f32.vlgmr.msrb.gmra.mxu0 %v857_v40 }
 0x165   : > { %967 = vmatpush.msrb.mxu1 %v830_v36 }
 0x167   : > { %968 = vmatpush.msrb.mxu1 %v828_v22 }
 0x169   : > { %969 = vmatpush.msrb.mxu1 %v826_v59 }
 0x16a   : > { %970 = vmatmul.f32.vlgmr.msrb.gmra.mxu1 %v857_v40 }
 0x16c   : > { %932 = vmatmul.f32.gmra.mxu0 %v858_v19 }
 0x172   : > { %973 = vmatmul.f32.gmra.mxu1 %v858_v19  ;;  %v1012_v19 = vld [vmem:[%s1958_s5 + $0x8] sm:$0xff] }
 0x174   : > { %935 = vmatmul.f32.gmra.mxu0 %v859_v47 }
 0x17a   : > { %976 = vmatmul.f32.gmra.mxu1 %v859_v47  ;;  %v1013_v47 = vld [vmem:[%s1958_s5 + $0x10] sm:$0xff] }
 0x17c   : > { %938 = vmatmul.f32.gmra.mxu0 %v860_v28 }
 0x182   : > { %979 = vmatmul.f32.gmra.mxu1 %v860_v28  ;;  %v1014_v28 = vld [vmem:[%s1958_s5 + $0x18] sm:$0xff] }
 0x184   : > { %941 = vmatmul.f32.gmra.mxu0 %v861_v20 }
 0x18a   : > { %982 = vmatmul.f32.gmra.mxu1 %v861_v20 }
 0x18c   : > { %944 = vmatmul.f32.gmra.mxu0 %v862_v38 }
 0x192   : > { %985 = vmatmul.f32.gmra.mxu1 %v862_v38 }
 0x194   : > { %947 = vmatmul.f32.gmra.mxu0 %v863_v8 }
 0x19a   : > { %988 = vmatmul.f32.gmra.mxu1 %v863_v8 }
 0x19c   : > { %950 = vmatmul.f32.gmra.mxu0 %v864_v23 }
 0x1a2   : > { %991 = vmatmul.f32.gmra.mxu1 %v864_v23 }
 0x1e1   : > { %v930_v24 = vpop.f32.mrf.mxu0 }
 0x1e2   : > { %v931_v0 = vadd.f32 %v930_v24, %v876_v37 }
 0x1e4   : > { %v995_v34 = vmax.f32 %v931_v0, 0.0 }
 0x1e7   : > { %v1904_v25 = vpop.f32.mrf.mxu1 }
 0x1e8   : > { %v972_v16 = vadd.f32 %v1904_v25, %v876_v37  ;;  %v1037_v25 = vpop.permute.xlu0 %1036 }
 0x1e9   : > { %v933_v26 = vpop.f32.mrf.mxu0 }
 0x1ea   : > { %v934_v57 = vadd.f32 %v933_v26, %v881_v48  ;;  %v996_v59 = vmax.f32 %v972_v16, 0.0 }
 0x1ec   : > { %v997_v11 = vmax.f32 %v934_v57, 0.0 }
 0x1ef   : > { %v974_v29 = vpop.f32.mrf.mxu1 }
 0x1f0   : > { %v975_v27 = vadd.f32 %v974_v29, %v881_v48  ;;  %v1032_v29 = vpop.permute.xlu1 %1031 }
 0x1f1   : > { %v936_v30 = vpop.f32.mrf.mxu0 }
 0x1f2   : > { %v937_v50 = vadd.f32 %v936_v30, %v886_v41  ;;  %v998_v22 = vmax.f32 %v975_v27, 0.0 }
 0x1f4   : > { %v999_v39 = vmax.f32 %v937_v50, 0.0 }
 0x1f7   : > { %v977_v31 = vpop.f32.mrf.mxu1 }
 0x1f8   : > { %v978_v21 = vadd.f32 %v977_v31, %v886_v41 }
 0x1f9   : > { %v939_v33 = vpop.f32.mrf.mxu0 }
 0x1fa   : > { %v940_v45 = vadd.f32 %v939_v33, %v891_v46  ;;  %v1000_v36 = vmax.f32 %v978_v21, 0.0 }
 0x1fc   : > { %v1001_v58 = vmax.f32 %v940_v45, 0.0 }
 0x1ff   : > { %v980_v2 = vpop.f32.mrf.mxu1 }
 0x200   : > { %v981_v3 = vadd.f32 %v980_v2, %v891_v46  ;;  %v1027_v2 = vpop.permute.xlu2 %1026 }
 0x201   : > { %v942_v5 = vpop.f32.mrf.mxu0 }
 0x202   : > { %v943_v63 = vadd.f32 %v942_v5, %v896_v7  ;;  %v1002_v40 = vmax.f32 %v981_v3, 0.0 }
 0x204   : > { %v1003_v35 = vmax.f32 %v943_v63, 0.0 }
 0x207   : > { %v983_v55 = vpop.f32.mrf.mxu1 }
 0x208   : > { %v984_v53 = vadd.f32 %v983_v55, %v896_v7 }
 0x209   : > { %v945_v51 = vpop.f32.mrf.mxu0 }
 0x20a   : > { %v946_v15 = vadd.f32 %v945_v51, %v901_v60  ;;  %v1004_v61 = vmax.f32 %v984_v53, 0.0  ;;  %v1022_v51 = vpop.permute.xlu0 %1021 }
 0x20c   : > { %v1005_v1 = vmax.f32 %v946_v15, 0.0 }
 0x20f   : > { %v986_v9 = vpop.f32.mrf.mxu1 }
 0x210   : > { %v987_v56 = vadd.f32 %v986_v9, %v901_v60 }
 0x211   : > { %v948_v43 = vpop.f32.mrf.mxu0 }
 0x212   : > { %v949_v62 = vadd.f32 %v948_v43, %v906_v12  ;;  %v1006_v18 = vmax.f32 %v987_v56, 0.0 }
 0x214   : > { %v1007_v32 = vmax.f32 %v949_v62, 0.0 }
 0x217   : > { %v989_v52 = vpop.f32.mrf.mxu1 }
 0x218   : > { %v990_v54 = vadd.f32 %v989_v52, %v906_v12 }
 0x219   : > { %v951_v13 = vpop.f32.mrf.mxu0 }
 0x21a   : > { %v952_v10 = vadd.f32 %v951_v13, %v911_v6  ;;  %v1008_v44 = vmax.f32 %v990_v54, 0.0 }
 0x21c   : > { %v1009_v17 = vmax.f32 %v952_v10, 0.0  ;;  %v1118_v10 = vld [vmem:[%s1974_s8] sm:$0x7] }
 0x21e   : > { %1060 = vmatpush.msrb.mxu2 %v1009_v17 }
 0x21f   : > { %v992_v4 = vpop.f32.mrf.mxu1 }
 0x220   : > { %1061 = vmatpush.msrb.mxu2 %v1007_v32  ;;  %v993_v14 = vadd.f32 %v992_v4, %v911_v6 }
 0x222   : > { %1062 = vmatpush.msrb.mxu2 %v1005_v1  ;;  %v1010_v42 = vmax.f32 %v993_v14, 0.0 }
 0x224   : > { %1063 = vmatpush.msrb.mxu2 %v1003_v35  ;;  %1089 = vmatpush.msrb.mxu3 %v1010_v42 }
 0x226   : > { %1064 = vmatpush.msrb.mxu2 %v1001_v58  ;;  %1090 = vmatpush.msrb.mxu3 %v1008_v44 }
 0x228   : > { %1065 = vmatpush.msrb.mxu2 %v999_v39  ;;  %1091 = vmatpush.msrb.mxu3 %v1006_v18 }
 0x22a   : > { %1066 = vmatpush.msrb.mxu2 %v997_v11  ;;  %1092 = vmatpush.msrb.mxu3 %v1004_v61 }
 0x22c   : > { %1067 = vmatpush.msrb.mxu2 %v995_v34  ;;  %1093 = vmatpush.msrb.mxu3 %v1002_v40 }
 0x22d   : > { %1288 = vmatmul.msk.f32.vlgmr.msrb.gmra.mxu2 %vm1039_vm0, %v1011_v49 }
 0x22e   : > { %1094 = vmatpush.msrb.mxu3 %v1000_v36 }
 0x230   : > { %1095 = vmatpush.msrb.mxu3 %v998_v22 }
 0x232   : > { %1096 = vmatpush.msrb.mxu3 %v996_v59 }
 0x233   : > { %1292 = vmatmul.msk.f32.vlgmr.msrb.gmra.mxu3 %vm1039_vm0, %v1011_v49 }
 0x235   : > { %1289 = vmatmul.msk.f32.gmra.mxu2 %vm1039_vm0, %v1012_v19 }
 0x23b   : > { %1293 = vmatmul.msk.f32.gmra.mxu3 %vm1039_vm0, %v1012_v19 }
 0x23d   : > { %1290 = vmatmul.msk.f32.gmra.mxu2 %vm1039_vm0, %v1013_v47 }
 0x243   : > { %1294 = vmatmul.msk.f32.gmra.mxu3 %vm1039_vm0, %v1013_v47 }
 0x245   : > { %1291 = vmatmul.msk.f32.gmra.mxu2 %vm1039_vm0, %v1014_v28 }
 0x24b   : > { %1295 = vmatmul.msk.f32.gmra.mxu3 %vm1039_vm0, %v1014_v28 }
 0x2b0   : > { %v1069_v20 = vpop.f32.mrf.mxu2 }
 0x2b1   : > { %v1070_v6 = vadd.f32 %v1069_v20, %v1022_v51 }
 0x2b3   : > { %v1110_v7 = vmax.f32 %v1070_v6, 0.0 }
 0x2b6   : > { %v1098_v38 = vpop.f32.mrf.mxu3 }
 0x2b7   : > { %v1099_v46 = vadd.f32 %v1098_v38, %v1022_v51 }
 0x2b8   : > { %v1072_v8 = vpop.f32.mrf.mxu2 }
 0x2b9   : > { %v1073_v5 = vadd.f32 %v1072_v8, %v1027_v2  ;;  %v1111_v63 = vmax.f32 %v1099_v46, 0.0 }
 0x2bb   : > { %v1112_v12 = vmax.f32 %v1073_v5, 0.0 }
 0x2be   : > { %v1101_v23 = vpop.f32.mrf.mxu3 }
 0x2bf   : > { %v1102_v13 = vadd.f32 %v1101_v23, %v1027_v2 }
 0x2c0   : > { %v1075_v24 = vpop.f32.mrf.mxu2 }
 0x2c1   : > { %v1076_v31 = vadd.f32 %v1075_v24, %v1032_v29  ;;  %v1113_v17 = vmax.f32 %v1102_v13, 0.0 }
 0x2c3   : > { %v1114_v9 = vmax.f32 %v1076_v31, 0.0 }
 0x2c6   : > { %v1104_v26 = vpop.f32.mrf.mxu3 }
 0x2c7   : > { %v1105_v60 = vadd.f32 %v1104_v26, %v1032_v29 }
 0x2c8   : > { %v1078_v30 = vpop.f32.mrf.mxu2 }
 0x2c9   : > { %v1079_v33 = vadd.f32 %v1078_v30, %v1037_v25  ;;  %v1115_v15 = vmax.f32 %v1105_v60, 0.0 }
 0x2cb   : > { %v1116_v55 = vmax.f32 %v1079_v33, 0.0 }
 0x2cd   : > { %1135 = vmatpush.msra.mxu2 %v1116_v55 }
 0x2ce   : > { %v1107_v43 = vpop.f32.mrf.mxu3 }
 0x2cf   : > { %1136 = vmatpush.msra.mxu2 %v1114_v9  ;;  %v1108_v52 = vadd.f32 %v1107_v43, %v1037_v25 }
 0x2d1   : > { %1137 = vmatpush.msra.mxu2 %v1112_v12  ;;  %v1117_v62 = vmax.f32 %v1108_v52, 0.0 }
 0x2d3   : > { %1138 = vmatpush.msra.mxu2 %v1110_v7  ;;  %1155 = vmatpush.msra.mxu3 %v1117_v62 }
 0x2d4   : > { %1296 = vmatmul.msk.f32.vlgmr.msra.gmra.mxu2 %vm1119_vm1, %v1118_v10 }
 0x2d5   : > { %1156 = vmatpush.msra.mxu3 %v1115_v15 }
 0x2d7   : > { %1157 = vmatpush.msra.mxu3 %v1113_v17 }
 0x2d9   : > { %1158 = vmatpush.msra.mxu3 %v1111_v63 }
 0x2da   : > { %1297 = vmatmul.msk.f32.vlgmr.msra.gmra.mxu3 %vm1119_vm1, %v1118_v10 }
 0x357   : > { %v1140_v45 = vpop.f32.mrf.mxu2 }
 0x35d   : > { %v1160_v32 = vpop.f32.mrf.mxu3 }
 0x35e   : > { %v1165_v1 = vrot.slane %v1160_v32, 4 }
 0x360   : > { %v1167_v4 = vsel %vm1166_vm2, %v1140_v45, %v1165_v1 }
 0x361   : > { %1169 = vst [vmem:[%s371_s21] sm:$0x77] %v1167_v4 }
 0x362 PF: > { %s22_s10 = sadd.s32 1, %s1488_s10   ;;  %s1976_s30 = sld [smem:[#allocation8_spill]] }
 0x363   : > { %p19_p2 = scmp.ge.s32.totalorder %s22_s10, 4   ;;  %s1977_s9 = sld [smem:[#allocation9_spill]] }
 0x364   : > { %s1978_s27 = smov %s1472_s28  ;;  %s1979_s28 = smov %s1476_s29 }
 0x365   : > { %s1980_s29 = smov %s1609_s14  ;;  %21 = sbr.rel (!%p19_p2) target bundleno = 9 (0x9), region = 96 }
 0x36a   :  { %1200 = vsyncpa [#allocation3], 1 }
 0x36b   :  { %1202 = vsyncpa [#allocation3 + $0x1], 1 }
 0x36c   :  { %1203 = vsyncpa [#allocation5], 1 }

</bundles_post_ra>
